<compile_context>
chip_gen: v6e
topology: v6e:2x2x1
jax: 0.10.0
libtpu: 0.0.40
codegen_flags: <defaults>
</compile_context>

<pallas_src>
import functools

import jax
import jax.numpy as jnp
from jax import lax
from jax.experimental import pallas as pl
from jax.experimental.pallas import tpu as pltpu

OUT_HEIGHT = 8
OUT_WIDTH = 14
BN_EPS = 1e-5
LANE = 128


def _round_up(x, m):
    return (x + m - 1) // m * m


def _ffn_kernel(patches_ref, w1_ref, b1_ref, w2_ref, b2_ref,
                g1_ref, be1_ref, g2_ref, be2_ref, g3_ref, be3_ref,
                out_ref, *, n_valid, c):
    """All activations are in (C, Mp) layout: channels on sublanes, flattened
    N*H*W positions on lanes (zero-padded up to Mp, a multiple of 128).

      patches_ref : (9C, Mp) im2col patch matrix (tap-major rows; 0 in pad lanes)
      w1_ref      : (C, 9C)  conv1 weight, matching tap-major K ordering
      w2_ref      : (C, C)   conv2 (1x1) weight
      b*/g*/be*   : (C, 1)   conv biases / BN affine params
      out_ref     : (C, Mp)  lane-dense output
    """
    mp = out_ref.shape[1]
    inv_n = 1.0 / float(n_valid)

    # Lane-validity mask: pad lanes are excluded from the batch statistics.
    valid = (lax.broadcasted_iota(jnp.int32, (1, mp), 1) < n_valid
             ).astype(jnp.float32)

    def bn_train(v, g_ref, b_ref):
        # Train-mode BatchNorm2d: biased stats over (N, H, W) per channel ==
        # masked lane-axis reduction per sublane row.
        mu = jnp.sum(v * valid, axis=1, keepdims=True) * inv_n
        d = v - mu
        var = jnp.sum(d * d * valid, axis=1, keepdims=True) * inv_n
        # Per-channel scale/shift precompute, applied as a single FMA.
        scale = g_ref[...] * lax.rsqrt(var + BN_EPS)      # rsqrt -> EUP
        shift = b_ref[...] - mu * scale
        return v * scale + shift

    def elu(v):
        # exp only on the clamped value (no inf in the unselected branch).
        return jnp.where(v > 0.0, v, jnp.exp(jnp.minimum(v, 0.0)) - 1.0)

    patches = patches_ref[...]

    # ---- conv1: 3x3 pad=1 as ONE im2col matmul (C, 9C) x (9C, Mp) on the MXU.
    h = jnp.dot(w1_ref[...], patches, preferred_element_type=jnp.float32)
    h = h + b1_ref[...]
    h = elu(bn_train(h, g1_ref, be1_ref))

    # ---- conv2: 1x1 == (C, C) x (C, Mp) matmul.
    h = jnp.dot(w2_ref[...], h, preferred_element_type=jnp.float32)
    h = h + b2_ref[...]
    h = elu(bn_train(h, g2_ref, be2_ref))

    # ---- residual + final BatchNorm (self.ln with use_ln=False).
    # The centre tap (ky=kx=1) of the patch matrix IS the original input
    # (sublane-aligned static slice: offset 4*C is a multiple of 8).
    x_orig = patches[4 * c:5 * c, :]
    y = bn_train(h + x_orig, g3_ref, be3_ref)

    out_ref[...] = y.astype(out_ref.dtype)


@jax.jit
def ffn_forward_pallas(x_nchw, params):
    """x_nchw: (N, C, H, W) float32. Returns (N, C, H, W) float32."""
    w1, b1, w2, b2, g1, be1, g2, be2, g3, be3 = params
    N, C, H, W = x_nchw.shape
    M = N * H * W
    Mp = _round_up(M, LANE)

    # --- glue (fused by XLA under jit): build the lane-dense im2col patch
    # matrix (9C, Mp) with channels on rows and flattened N*H*W on columns.
    xp = jnp.pad(x_nchw, ((0, 0), (0, 0), (1, 1), (1, 1)))
    taps = [xp[:, :, ky:ky + H, kx:kx + W]            # each (N, C, H, W)
            for ky in range(3) for kx in range(3)]
    patches = (jnp.stack(taps, axis=0)                # (9, N, C, H, W)
               .transpose(0, 2, 1, 3, 4)              # (9, C, N, H, W)
               .reshape(9 * C, M))
    patches = jnp.pad(patches, ((0, 0), (0, Mp - M)))  # (9C, Mp)

    # Weights laid out for left-multiplication in (C, M) space.
    # conv1: (Cout, Cin, 3, 3) -> (Cout, 3, 3, Cin) -> (Cout, 9*Cin)
    w1_k = jnp.transpose(w1, (0, 2, 3, 1)).reshape(C, 9 * C)
    # conv2: (Cout, Cin, 1, 1) -> (Cout, Cin); no transpose needed.
    w2_k = w2[:, :, 0, 0]
    col = lambda v: v.reshape(C, 1)

    vmem = pl.BlockSpec(memory_space=pltpu.MemorySpace.VMEM)
    kernel = functools.partial(_ffn_kernel, n_valid=M, c=C)

    # Whole problem (< 0.5 MiB) fits in VMEM comfortably on v5e/v6e/v7x, so a
    # single grid-less invocation is used; a grid over M (with two-pass BN
    # stats) only pays off at much larger N*H*W.
    out2d = pl.pallas_call(
        kernel,
        out_shape=jax.ShapeDtypeStruct((C, Mp), jnp.float32),
        in_specs=[vmem] * 11,
        out_specs=vmem,
    )(patches, w1_k, col(b1), w2_k, col(b2),
      col(g1), col(be1), col(g2), col(be2), col(g3), col(be3))

    # Back to PyTorch-style NCHW (small epilogue fusion under jit).
    return out2d[:, :M].reshape(C, N, H, W).transpose(1, 0, 2, 3)


@jax.jit
def ffn_forward_reference(x_nchw, params):
    """Pure-JAX reference (NCHW, matches PyTorch training-mode BN)."""
    w1, b1, w2, b2, g1, be1, g2, be2, g3, be3 = params

    def bn(v, g, b):
        mu = jnp.mean(v, axis=(0, 2, 3), keepdims=True)
        var = jnp.mean((v - mu) ** 2, axis=(0, 2, 3), keepdims=True)
        return (v - mu) * lax.rsqrt(var + BN_EPS) * g[None, :, None, None] \
            + b[None, :, None, None]

    def elu(v):
        return jnp.where(v > 0, v, jnp.exp(jnp.minimum(v, 0.0)) - 1.0)

    conv = functools.partial(
        lax.conv_general_dilated,
        dimension_numbers=("NCHW", "OIHW", "NCHW"))
    h = conv(x_nchw, w1, window_strides=(1, 1), padding=((1, 1), (1, 1)))
    h = h + b1[None, :, None, None]
    h = elu(bn(h, g1, be1))
    h = conv(h, w2, window_strides=(1, 1), padding=((0, 0), (0, 0)))
    h = h + b2[None, :, None, None]
    h = elu(bn(h, g2, be2))
    return bn(h + x_nchw, g3, be3)


def make_params(key, num_class):
    C = num_class
    keys = jax.random.split(key, 6)
    w1 = jax.random.normal(keys[0], (C, C, 3, 3), jnp.float32) * 0.1
    b1 = jax.random.normal(keys[1], (C,), jnp.float32) * 0.1
    w2 = jax.random.normal(keys[2], (C, C, 1, 1), jnp.float32) * 0.1
    b2 = jax.random.normal(keys[3], (C,), jnp.float32) * 0.1
    g1 = 1.0 + 0.1 * jax.random.normal(keys[4], (C,), jnp.float32)
    be1 = 0.1 * jax.random.normal(keys[5], (C,), jnp.float32)
    g2 = jnp.ones((C,), jnp.float32)
    be2 = jnp.zeros((C,), jnp.float32)
    g3 = jnp.ones((C,), jnp.float32)
    be3 = jnp.zeros((C,), jnp.float32)
    return (w1, b1, w2, b2, g1, be1, g2, be2, g3, be3)


if __name__ == "__main__":
    # Shapes consistent with the module: spatial = (OUT_HEIGHT, OUT_WIDTH).
    N, C, H, W = 2, 16, OUT_HEIGHT, OUT_WIDTH      # num_class=16 for the demo
    key = jax.random.PRNGKey(0)
    kx, kp = jax.random.split(key)
    x = jax.random.normal(kx, (N, C, H, W), jnp.float32)
    params = make_params(kp, C)

    out = jax.block_until_ready(ffn_forward_pallas(x, params))
    ref = jax.block_until_ready(ffn_forward_reference(x, params))

    assert out.shape == (N, C, H, W)
    assert jnp.allclose(out, ref, atol=1e-4, rtol=1e-4), \
        f"max abs err {jnp.max(jnp.abs(out - ref))}"
    print("KERNEL_OK")
</pallas_src>

<mosaic_0001>
module attributes {stable_mosaic.version = 11 : i64} {
  func.func @_ffn_kernel(%arg0: memref<144x256xf32, #tpu.memory_space<vmem>>, %arg1: memref<16x144xf32, #tpu.memory_space<vmem>>, %arg2: memref<16x1xf32, #tpu.memory_space<vmem>>, %arg3: memref<16x16xf32, #tpu.memory_space<vmem>>, %arg4: memref<16x1xf32, #tpu.memory_space<vmem>>, %arg5: memref<16x1xf32, #tpu.memory_space<vmem>>, %arg6: memref<16x1xf32, #tpu.memory_space<vmem>>, %arg7: memref<16x1xf32, #tpu.memory_space<vmem>>, %arg8: memref<16x1xf32, #tpu.memory_space<vmem>>, %arg9: memref<16x1xf32, #tpu.memory_space<vmem>>, %arg10: memref<16x1xf32, #tpu.memory_space<vmem>>, %arg11: memref<16x256xf32, #tpu.memory_space<vmem>>) attributes {dimension_semantics = [], scalar_prefetch = 0 : i64, scratch_operands = 0 : i64, tpu.core_type = #tpu.core_type<tc>} {
    %0 = tpu.iota {dimensions = array<i32: 1>} : vector<1x256xi32>
    %c224_i32 = arith.constant 224 : i32
    %1 = vector.broadcast %c224_i32 : i32 to vector<1x256xi32>
    %2 = arith.cmpi slt, %0, %1 : vector<1x256xi32>
    %3 = arith.extui %2 : vector<1x256xi1> to vector<1x256xi32>
    %4 = arith.sitofp %3 : vector<1x256xi32> to vector<1x256xf32>
    %c0 = arith.constant 0 : index
    %c0_0 = arith.constant 0 : index
    %5 = vector.load %arg0[%c0, %c0_0] : memref<144x256xf32, #tpu.memory_space<vmem>>, vector<144x256xf32>
    %c0_1 = arith.constant 0 : index
    %c0_2 = arith.constant 0 : index
    %6 = vector.load %arg1[%c0_1, %c0_2] : memref<16x144xf32, #tpu.memory_space<vmem>>, vector<16x144xf32>
    %cst = arith.constant dense<0.000000e+00> : vector<16x256xf32>
    %7 = tpu.matmul %6, %5, %cst {dimension_numbers = #tpu.dot_dimension_numbers<[1], [0], [0], [1], [0, 0, 1, 1], [], []>} : vector<16x144xf32>, vector<144x256xf32>, vector<16x256xf32> -> vector<16x256xf32>
    %c0_3 = arith.constant 0 : index
    %c0_4 = arith.constant 0 : index
    %8 = vector.load %arg2[%c0_3, %c0_4] : memref<16x1xf32, #tpu.memory_space<vmem>>, vector<16x1xf32>
    %9 = vector.broadcast %8 : vector<16x1xf32> to vector<16x256xf32>
    %10 = arith.addf %7, %9 : vector<16x256xf32>
    %11 = vector.broadcast %4 : vector<1x256xf32> to vector<16x256xf32>
    %12 = arith.mulf %10, %11 : vector<16x256xf32>
    %cst_5 = arith.constant dense<0.000000e+00> : vector<16xf32>
    %13 = vector.multi_reduction <add>, %12, %cst_5 [1] : vector<16x256xf32> to vector<16xf32>
    %14 = vector.shape_cast %13 : vector<16xf32> to vector<16x1xf32>
    %cst_6 = arith.constant 0.00446428591 : f32
    %15 = vector.broadcast %cst_6 : f32 to vector<16x1xf32>
    %16 = arith.mulf %14, %15 : vector<16x1xf32>
    %17 = vector.broadcast %16 : vector<16x1xf32> to vector<16x256xf32>
    %18 = arith.subf %10, %17 : vector<16x256xf32>
    %19 = arith.mulf %18, %18 : vector<16x256xf32>
    %20 = vector.broadcast %4 : vector<1x256xf32> to vector<16x256xf32>
    %21 = arith.mulf %19, %20 : vector<16x256xf32>
    %cst_7 = arith.constant dense<0.000000e+00> : vector<16xf32>
    %22 = vector.multi_reduction <add>, %21, %cst_7 [1] : vector<16x256xf32> to vector<16xf32>
    %23 = vector.shape_cast %22 : vector<16xf32> to vector<16x1xf32>
    %cst_8 = arith.constant 0.00446428591 : f32
    %24 = vector.broadcast %cst_8 : f32 to vector<16x1xf32>
    %25 = arith.mulf %23, %24 : vector<16x1xf32>
    %c0_9 = arith.constant 0 : index
    %c0_10 = arith.constant 0 : index
    %26 = vector.load %arg5[%c0_9, %c0_10] : memref<16x1xf32, #tpu.memory_space<vmem>>, vector<16x1xf32>
    %cst_11 = arith.constant 9.99999974E-6 : f32
    %27 = vector.broadcast %cst_11 : f32 to vector<16x1xf32>
    %28 = arith.addf %25, %27 : vector<16x1xf32>
    %29 = math.rsqrt %28 : vector<16x1xf32>
    %30 = arith.mulf %26, %29 : vector<16x1xf32>
    %c0_12 = arith.constant 0 : index
    %c0_13 = arith.constant 0 : index
    %31 = vector.load %arg6[%c0_12, %c0_13] : memref<16x1xf32, #tpu.memory_space<vmem>>, vector<16x1xf32>
    %32 = arith.mulf %16, %30 : vector<16x1xf32>
    %33 = arith.subf %31, %32 : vector<16x1xf32>
    %34 = vector.broadcast %30 : vector<16x1xf32> to vector<16x256xf32>
    %35 = arith.mulf %10, %34 : vector<16x256xf32>
    %36 = vector.broadcast %33 : vector<16x1xf32> to vector<16x256xf32>
    %37 = arith.addf %35, %36 : vector<16x256xf32>
    %cst_14 = arith.constant 0.000000e+00 : f32
    %38 = vector.broadcast %cst_14 : f32 to vector<16x256xf32>
    %39 = arith.cmpf ogt, %37, %38 : vector<16x256xf32>
    %cst_15 = arith.constant 0.000000e+00 : f32
    %40 = vector.broadcast %cst_15 : f32 to vector<16x256xf32>
    %41 = arith.minimumf %37, %40 : vector<16x256xf32>
    %42 = math.exp %41 : vector<16x256xf32>
    %cst_16 = arith.constant 1.000000e+00 : f32
    %43 = vector.broadcast %cst_16 : f32 to vector<16x256xf32>
    %44 = arith.subf %42, %43 : vector<16x256xf32>
    %45 = arith.select %39, %37, %44 : vector<16x256xi1>, vector<16x256xf32>
    %c0_17 = arith.constant 0 : index
    %c0_18 = arith.constant 0 : index
    %46 = vector.load %arg3[%c0_17, %c0_18] : memref<16x16xf32, #tpu.memory_space<vmem>>, vector<16x16xf32>
    %cst_19 = arith.constant dense<0.000000e+00> : vector<16x256xf32>
    %47 = tpu.matmul %46, %45, %cst_19 {dimension_numbers = #tpu.dot_dimension_numbers<[1], [0], [0], [1], [0, 0, 1, 1], [], []>} : vector<16x16xf32>, vector<16x256xf32>, vector<16x256xf32> -> vector<16x256xf32>
    %c0_20 = arith.constant 0 : index
    %c0_21 = arith.constant 0 : index
    %48 = vector.load %arg4[%c0_20, %c0_21] : memref<16x1xf32, #tpu.memory_space<vmem>>, vector<16x1xf32>
    %49 = vector.broadcast %48 : vector<16x1xf32> to vector<16x256xf32>
    %50 = arith.addf %47, %49 : vector<16x256xf32>
    %51 = vector.broadcast %4 : vector<1x256xf32> to vector<16x256xf32>
    %52 = arith.mulf %50, %51 : vector<16x256xf32>
    %cst_22 = arith.constant dense<0.000000e+00> : vector<16xf32>
    %53 = vector.multi_reduction <add>, %52, %cst_22 [1] : vector<16x256xf32> to vector<16xf32>
    %54 = vector.shape_cast %53 : vector<16xf32> to vector<16x1xf32>
    %cst_23 = arith.constant 0.00446428591 : f32
    %55 = vector.broadcast %cst_23 : f32 to vector<16x1xf32>
    %56 = arith.mulf %54, %55 : vector<16x1xf32>
    %57 = vector.broadcast %56 : vector<16x1xf32> to vector<16x256xf32>
    %58 = arith.subf %50, %57 : vector<16x256xf32>
    %59 = arith.mulf %58, %58 : vector<16x256xf32>
    %60 = vector.broadcast %4 : vector<1x256xf32> to vector<16x256xf32>
    %61 = arith.mulf %59, %60 : vector<16x256xf32>
    %cst_24 = arith.constant dense<0.000000e+00> : vector<16xf32>
    %62 = vector.multi_reduction <add>, %61, %cst_24 [1] : vector<16x256xf32> to vector<16xf32>
    %63 = vector.shape_cast %62 : vector<16xf32> to vector<16x1xf32>
    %cst_25 = arith.constant 0.00446428591 : f32
    %64 = vector.broadcast %cst_25 : f32 to vector<16x1xf32>
    %65 = arith.mulf %63, %64 : vector<16x1xf32>
    %c0_26 = arith.constant 0 : index
    %c0_27 = arith.constant 0 : index
    %66 = vector.load %arg7[%c0_26, %c0_27] : memref<16x1xf32, #tpu.memory_space<vmem>>, vector<16x1xf32>
    %cst_28 = arith.constant 9.99999974E-6 : f32
    %67 = vector.broadcast %cst_28 : f32 to vector<16x1xf32>
    %68 = arith.addf %65, %67 : vector<16x1xf32>
    %69 = math.rsqrt %68 : vector<16x1xf32>
    %70 = arith.mulf %66, %69 : vector<16x1xf32>
    %c0_29 = arith.constant 0 : index
    %c0_30 = arith.constant 0 : index
    %71 = vector.load %arg8[%c0_29, %c0_30] : memref<16x1xf32, #tpu.memory_space<vmem>>, vector<16x1xf32>
    %72 = arith.mulf %56, %70 : vector<16x1xf32>
    %73 = arith.subf %71, %72 : vector<16x1xf32>
    %74 = vector.broadcast %70 : vector<16x1xf32> to vector<16x256xf32>
    %75 = arith.mulf %50, %74 : vector<16x256xf32>
    %76 = vector.broadcast %73 : vector<16x1xf32> to vector<16x256xf32>
    %77 = arith.addf %75, %76 : vector<16x256xf32>
    %cst_31 = arith.constant 0.000000e+00 : f32
    %78 = vector.broadcast %cst_31 : f32 to vector<16x256xf32>
    %79 = arith.cmpf ogt, %77, %78 : vector<16x256xf32>
    %cst_32 = arith.constant 0.000000e+00 : f32
    %80 = vector.broadcast %cst_32 : f32 to vector<16x256xf32>
    %81 = arith.minimumf %77, %80 : vector<16x256xf32>
    %82 = math.exp %81 : vector<16x256xf32>
    %cst_33 = arith.constant 1.000000e+00 : f32
    %83 = vector.broadcast %cst_33 : f32 to vector<16x256xf32>
    %84 = arith.subf %82, %83 : vector<16x256xf32>
    %85 = arith.select %79, %77, %84 : vector<16x256xi1>, vector<16x256xf32>
    %86 = vector.extract_strided_slice %5 {offsets = [64, 0], sizes = [16, 256], strides = [1, 1]} : vector<144x256xf32> to vector<16x256xf32>
    %87 = arith.addf %85, %86 : vector<16x256xf32>
    %88 = vector.broadcast %4 : vector<1x256xf32> to vector<16x256xf32>
    %89 = arith.mulf %87, %88 : vector<16x256xf32>
    %cst_34 = arith.constant dense<0.000000e+00> : vector<16xf32>
    %90 = vector.multi_reduction <add>, %89, %cst_34 [1] : vector<16x256xf32> to vector<16xf32>
    %91 = vector.shape_cast %90 : vector<16xf32> to vector<16x1xf32>
    %cst_35 = arith.constant 0.00446428591 : f32
    %92 = vector.broadcast %cst_35 : f32 to vector<16x1xf32>
    %93 = arith.mulf %91, %92 : vector<16x1xf32>
    %94 = vector.broadcast %93 : vector<16x1xf32> to vector<16x256xf32>
    %95 = arith.subf %87, %94 : vector<16x256xf32>
    %96 = arith.mulf %95, %95 : vector<16x256xf32>
    %97 = vector.broadcast %4 : vector<1x256xf32> to vector<16x256xf32>
    %98 = arith.mulf %96, %97 : vector<16x256xf32>
    %cst_36 = arith.constant dense<0.000000e+00> : vector<16xf32>
    %99 = vector.multi_reduction <add>, %98, %cst_36 [1] : vector<16x256xf32> to vector<16xf32>
    %100 = vector.shape_cast %99 : vector<16xf32> to vector<16x1xf32>
    %cst_37 = arith.constant 0.00446428591 : f32
    %101 = vector.broadcast %cst_37 : f32 to vector<16x1xf32>
    %102 = arith.mulf %100, %101 : vector<16x1xf32>
    %c0_38 = arith.constant 0 : index
    %c0_39 = arith.constant 0 : index
    %103 = vector.load %arg9[%c0_38, %c0_39] : memref<16x1xf32, #tpu.memory_space<vmem>>, vector<16x1xf32>
    %cst_40 = arith.constant 9.99999974E-6 : f32
    %104 = vector.broadcast %cst_40 : f32 to vector<16x1xf32>
    %105 = arith.addf %102, %104 : vector<16x1xf32>
    %106 = math.rsqrt %105 : vector<16x1xf32>
    %107 = arith.mulf %103, %106 : vector<16x1xf32>
    %c0_41 = arith.constant 0 : index
    %c0_42 = arith.constant 0 : index
    %108 = vector.load %arg10[%c0_41, %c0_42] : memref<16x1xf32, #tpu.memory_space<vmem>>, vector<16x1xf32>
    %109 = arith.mulf %93, %107 : vector<16x1xf32>
    %110 = arith.subf %108, %109 : vector<16x1xf32>
    %111 = vector.broadcast %107 : vector<16x1xf32> to vector<16x256xf32>
    %112 = arith.mulf %87, %111 : vector<16x256xf32>
    %113 = vector.broadcast %110 : vector<16x1xf32> to vector<16x256xf32>
    %114 = arith.addf %112, %113 : vector<16x256xf32>
    %c0_43 = arith.constant 0 : index
    %c0_44 = arith.constant 0 : index
    %115 = vector.load %arg11[%c0_43, %c0_44] : memref<16x256xf32, #tpu.memory_space<vmem>>, vector<16x256xf32>
    tpu.vector_store %arg11[%c0_43, %c0_44], %114 {strides = array<i32>} : memref<16x256xf32, #tpu.memory_space<vmem>>, vector<16x256xf32>,
    return
  }
}

</mosaic_0001>

<bundles_post_ra>
// kernel: ffn_forward_pallas.1
= control target key start
LH: loop header
LB: loop body
LE: loop exit
PB: predicated region body
PF: predicated region fallthrough
CT: control target
= control target key end

     0   :  { %v607_v3 = vmov 0   ;;  %vm99_vm0 = vcmask 130048   ;;  %v608_v43 = vmov 0.0   ;;  %v38_v44 = vlaneseq  ;;  %s897_s0 = inlined_call_operand.vmem [shape: f32[144,256], index: 0, kind: input, shape index: {}]   ;;  %s898_s1 = inlined_call_operand.vmem [shape: f32[16,144], index: 1, kind: input, shape index: {}]   ;;  %s899_s2 = inlined_call_operand.vmem [shape: f32[16,1], index: 2, kind: input, shape index: {}]   ;;  %s900_s4 = inlined_call_operand.vmem [shape: f32[16,1], index: 4, kind: input, shape index: {}]   ;;  %s901_s5 = inlined_call_operand.vmem [shape: f32[16,1], index: 5, kind: input, shape index: {}]   ;;  %s902_s6 = inlined_call_operand.vmem [shape: f32[16,1], index: 6, kind: input, shape index: {}]   ;;  %s903_s3 = inlined_call_operand.vmem [shape: f32[16,16], index: 3, kind: input, shape index: {}]   ;;  %s904_s7 = inlined_call_operand.vmem [shape: f32[16,1], index: 7, kind: input, shape index: {}]   ;;  %s905_s8 = inlined_call_operand.vmem [shape: f32[16,1], index: 8, kind: input, shape index: {}]   ;;  %s906_s9 = inlined_call_operand.vmem [shape: f32[16,1], index: 9, kind: input, shape index: {}]   ;;  %s907_s10 = inlined_call_operand.vmem [shape: f32[16,1], index: 10, kind: input, shape index: {}]   ;;  %s908_s11 = inlined_call_operand.vmem [shape: f32[16,256], index: 11, kind: output, shape index: {}]  }
   0x1   :  { %v78_v0 = vld [vmem:[%s897_s0 + $0xf8] sm:$0xff]  ;;  %v77_v1 = vld [vmem:[%s897_s0 + $0xf0] sm:$0xff]  ;;  %v76_v2 = vld [vmem:[%s897_s0 + $0xe8] sm:$0xff]  ;;  %577 = vset.pattern.permute.xlu0 %v607_v3  ;;  %578 = vset.pattern.permute.xlu1 %v607_v3 }
   0x2   :  { %106 = vmatprep.subr.mxu0 %v78_v0  ;;  %v75_v4 = vld [vmem:[%s897_s0 + $0xe0] sm:$0xff]  ;;  %v74_v5 = vld [vmem:[%s897_s0 + $0xd8] sm:$0xff]  ;;  %v73_v6 = vld [vmem:[%s897_s0 + $0xd0] sm:$0xff]  ;;  %365 = vmatprep.mubr.f32.mxu1 %v608_v43  ;;  %v39_v45 = vand.u32 127, %v38_v44 }
   0x3   :  { %107 = vmatpush1.msra.mxu0 %v77_v1  ;;  %v72_v7 = vld [vmem:[%s897_s0 + $0xc8] sm:$0xff]  ;;  %v71_v8 = vld [vmem:[%s897_s0 + $0xc0] sm:$0xff]  ;;  %v70_v9 = vld [vmem:[%s897_s0 + $0xb8] sm:$0xff] }
   0x4   :  { %108 = vmatprep.subr.mxu0 %v76_v2  ;;  %v69_v10 = vld [vmem:[%s897_s0 + $0xb0] sm:$0xff]  ;;  %v68_v11 = vld [vmem:[%s897_s0 + $0xa8] sm:$0xff]  ;;  %v67_v12 = vld [vmem:[%s897_s0 + $0xa0] sm:$0xff]  ;;  %v40_v48 = vadd.s32 128, %v39_v45 }
   0x5   :  { %109 = vmatpush1.msra.mxu0 %v75_v4  ;;  %v708_v13 = vld [vmem:[%s897_s0 + $0x98] sm:$0xff]  ;;  %v713_v14 = vld [vmem:[%s897_s0 + $0x90] sm:$0xff]  ;;  %v718_v15 = vld [vmem:[%s897_s0 + $0x88] sm:$0xff] }
   0x6   :  { %110 = vmatprep.subr.mxu0 %v74_v5  ;;  %v84_v16 = vld [vmem:[%s898_s1 + $0x8] sm:$0xff]  ;;  %v727_v17 = vld [vmem:[%s897_s0 + $0x80] sm:$0xff]  ;;  %v62_v19 = vld [vmem:[%s897_s0 + $0x78] sm:$0xff]  ;;  %vm42_vm1 = vcmp.lt.s32.totalorder %v40_v48, 224 }
   0x7   :  { %111 = vmatpush1.msra.mxu0 %v73_v6  ;;  %563 = vmatprep.mubr.msk.f32.mxu0 %vm99_vm0, %v84_v16  ;;  %v88_v18 = vld [vmem:[%s899_s2 + $0x8] sm:$0xff]  ;;  %v61_v20 = vld [vmem:[%s897_s0 + $0x70] sm:$0xff]  ;;  %v87_v21 = vld [vmem:[%s899_s2] sm:$0xff]  ;;  %v813_v55 = vsel %vm42_vm1, 1.0, %v608_v43 }
   0x8   :  { %112 = vmatprep.subr.mxu0 %v72_v7  ;;  %96 = vperm.xlu0 %577, %v88_v18   ;;  %v60_v22 = vld [vmem:[%s897_s0 + $0x68] sm:$0xff]  ;;  %v59_v23 = vld [vmem:[%s897_s0 + $0x60] sm:$0xff]  ;;  %v58_v24 = vld [vmem:[%s897_s0 + $0x58] sm:$0xff] }
   0x9   :  { %113 = vmatpush1.msra.mxu0 %v71_v8  ;;  %v57_v25 = vld [vmem:[%s897_s0 + $0x50] sm:$0xff]  ;;  %v56_v26 = vld [vmem:[%s897_s0 + $0x48] sm:$0xff]  ;;  %v55_v27 = vld [vmem:[%s897_s0 + $0x40] sm:$0xff] }
   0xa   :  { %114 = vmatprep.subr.mxu0 %v70_v9  ;;  %v54_v28 = vld [vmem:[%s897_s0 + $0x38] sm:$0xff]  ;;  %v53_v29 = vld [vmem:[%s897_s0 + $0x30] sm:$0xff]  ;;  %v52_v30 = vld [vmem:[%s897_s0 + $0x28] sm:$0xff] }
   0xb   :  { %115 = vmatpush1.msra.mxu0 %v69_v10  ;;  %v51_v31 = vld [vmem:[%s897_s0 + $0x20] sm:$0xff]  ;;  %v50_v32 = vld [vmem:[%s897_s0 + $0x18] sm:$0xff]  ;;  %v49_v33 = vld [vmem:[%s897_s0 + $0x10] sm:$0xff] }
   0xc   :  { %116 = vmatprep.subr.mxu0 %v68_v11  ;;  %91 = vperm.xlu0 %577, %v87_v21   ;;  %v48_v34 = vld [vmem:[%s897_s0 + $0x8] sm:$0xff]  ;;  %v47_v35 = vld [vmem:[%s897_s0] sm:$0xff]  ;;  %v82_v36 = vld [vmem:[%s897_s0 + $0x118] sm:$0xff] }
   0xd   :  { %117 = vmatpush1.msra.mxu0 %v67_v12  ;;  %v81_v37 = vld [vmem:[%s897_s0 + $0x110] sm:$0xff]  ;;  %v80_v38 = vld [vmem:[%s897_s0 + $0x108] sm:$0xff]  ;;  %v79_v39 = vld [vmem:[%s897_s0 + $0x100] sm:$0xff] }
   0xe   :  { %118 = vmatprep.subr.mxu0 %v708_v13  ;;  %v83_v40 = vld [vmem:[%s898_s1] sm:$0xff]  ;;  %v86_v41 = vld [vmem:[%s898_s1 + $0x18] sm:$0xff]  ;;  %v85_v42 = vld [vmem:[%s898_s1 + $0x10] sm:$0xff] }
   0xf   :  { %119 = vmatpush1.msra.mxu0 %v713_v14  ;;  %v283_v18 = vld [vmem:[%s900_s4] sm:$0xff] }
  0x10   :  { %120 = vmatprep.subr.mxu0 %v718_v15 }
  0x11   :  { %121 = vmatpush1.msra.mxu0 %v727_v17 }
  0x12   :  { %122 = vmatprep.subr.mxu0 %v62_v19 }
  0x13   :  { %123 = vmatpush1.msra.mxu0 %v61_v20 }
  0x14   :  { %124 = vmatprep.subr.mxu0 %v60_v22 }
  0x15   :  { %125 = vmatpush1.msra.mxu0 %v59_v23 }
  0x16   :  { %126 = vmatprep.subr.mxu0 %v58_v24 }
  0x17   :  { %127 = vmatpush1.msra.mxu0 %v57_v25 }
  0x18   :  { %128 = vmatprep.subr.mxu0 %v56_v26  ;;  %v215_v26 = vld [vmem:[%s901_s5] sm:$0xff] }
  0x19   :  { %129 = vmatpush1.msra.mxu0 %v55_v27  ;;  %v216_v27 = vld [vmem:[%s901_s5 + $0x8] sm:$0xff] }
  0x1a   :  { %130 = vmatprep.subr.mxu0 %v54_v28 }
  0x1b   :  { %131 = vmatpush1.msra.mxu0 %v53_v29 }
  0x1c   :  { %132 = vmatprep.subr.mxu0 %v52_v30 }
  0x1d   :  { %133 = vmatpush1.msra.mxu0 %v51_v31 }
  0x1e   :  { %134 = vmatprep.subr.mxu0 %v50_v32  ;;  %v224_v32 = vld [vmem:[%s902_s6 + $0x8] sm:$0xff] }
  0x1f   :  { %135 = vmatpush1.msra.mxu0 %v49_v33 }
  0x20   :  { %136 = vmatprep.subr.mxu0 %v48_v34 }
  0x21   :  { %137 = vmatpush1.msra.mxu0 %v47_v35  ;;  %v223_v35 = vld [vmem:[%s902_s6] sm:$0xff] }
  0x22   :  { %166 = vmatprep.subr.mxu0 %v82_v36 }
  0x23   :  { %167 = vmatpush2.msra.mxu0 %v81_v37  ;;  %v284_v37 = vld [vmem:[%s900_s4 + $0x8] sm:$0xff] }
  0x24   :  { %168 = vmatprep.subr.mxu0 %v80_v38 }
  0x25   :  { %169 = vmatpush2.msra.mxu0 %v79_v39 }
  0x26   :  { %171 = vmatmul.mubr.f32.vlgmr.msra.gmra.mxu0 %v83_v40 }
  0x27   :  { %564 = vmatprep.mubr.msk.f32.mxu0 %vm99_vm0, %v86_v41 }
  0x2a   :  { %177 = vmatmul.mubr.f32.gmra.mxu0 %v85_v42 }
  0x83   :  { %v97_v46 = vpop.permute.xlu0 %96 }
  0x87   :  { %v92_v51 = vpop.permute.xlu0 %91 }
  0xe6   :  { %v172_v47 = vpop.f32.mrf.mxu0 }
  0xe7   :  { %v173_v60 = vadd.f32 %v172_v47, %v92_v51 }
  0xe8   :  { %v174_v49 = vpop.f32.mrf.mxu0 }
  0xe9   :  { %v810_v53 = vadd.f32 %v174_v49, %v92_v51 }
  0xea   :  { %v178_v50 = vpop.f32.mrf.mxu0 }
  0xeb   :  { %v179_v56 = vadd.f32 %v178_v50, %v97_v46  ;;  %v184_v59 = vmul.f32 %v813_v55, %v810_v53 }
  0xec   :  { %v180_v52 = vpop.f32.mrf.mxu0 }
  0xed   :  { %v181_v54 = vadd.f32 %v180_v52, %v97_v46  ;;  %v187_v61 = vadd.f32 %v184_v59, %v173_v60 }
  0xef   :  { %v186_v57 = vmul.f32 %v813_v55, %v181_v54 }
  0xf1   :  { %v190_v58 = vadd.f32 %v186_v57, %v179_v56 }
  0xf3   :  { %191 = vadd.xlane.f32.xlu1 %v190_v58 }
  0xf7   :  { %188 = vadd.xlane.f32.xlu1 %v187_v61 }
 0x17c   :  { %v192_v62 = vpop.xlane.xlu1 %191 }
 0x17d   :  { %v194_v63 = vmul.f32 0.004464286, %v192_v62 }
 0x17f   :  { %v198_v0 = vsub.f32 %v181_v54, %v194_v63  ;;  %v197_v1 = vsub.f32 %v179_v56, %v194_v63 }
 0x180   :  { %v189_v2 = vpop.xlane.xlu1 %188 }
 0x181   :  { %v193_v3 = vmul.f32 0.004464286, %v189_v2  ;;  %v202_v4 = vmul.f32 %v198_v0, %v198_v0  ;;  %v201_v6 = vmul.f32 %v197_v1, %v197_v1 }
 0x183   :  { %v196_v5 = vsub.f32 %v810_v53, %v193_v3  ;;  %v206_v7 = vmul.f32 %v813_v55, %v202_v4  ;;  %v195_v8 = vsub.f32 %v173_v60, %v193_v3 }
 0x185   :  { %v210_v9 = vadd.f32 %v206_v7, %v201_v6  ;;  %v200_v10 = vmul.f32 %v196_v5, %v196_v5  ;;  %v199_v11 = vmul.f32 %v195_v8, %v195_v8  ;;  %v281_v8 = vld [vmem:[%s903_s3] sm:$0xff] }
 0x187   :  { %211 = vadd.xlane.f32.xlu0 %v210_v9  ;;  %v204_v12 = vmul.f32 %v813_v55, %v200_v10  ;;  %v282_v9 = vld [vmem:[%s903_s3 + $0x8] sm:$0xff] }
 0x189   :  { %v207_v16 = vadd.f32 %v204_v12, %v199_v11 }
 0x18b   :  { %208 = vadd.xlane.f32.xlu1 %v207_v16 }
 0x19d   :  { %287 = vperm.xlu0 %577, %v283_v18  }
 0x210   :  { %v212_v19 = vpop.xlane.xlu0 %211 }
 0x211   :  { %v214_v20 = vmul.f32 0.004464286, %v212_v19 }
 0x213   :  { %v218_v21 = vadd.f32 1e-05, %v214_v20 }
 0x214   :  { %v209_v22 = vpop.xlane.xlu1 %208 }
 0x215   :  { %v213_v23 = vmul.f32 0.004464286, %v209_v22  ;;  %579 = vrsqrt.f32 %v218_v21 }
 0x217   :  { %v217_v24 = vadd.f32 1e-05, %v213_v23 }
 0x218   :  { %v288_v11 = vpop.permute.xlu0 %287 }
 0x219   :  { %581 = vrsqrt.f32 %v217_v24 }
 0x222   :  { %v580_v25 = vpop.eup %579 }
 0x223   :  { %v222_v30 = vmul.f32 %v580_v25, %v216_v27 }
 0x225   :  { %v226_v31 = vmul.f32 %v222_v30, %v194_v63 }
 0x226   :  { %v582_v28 = vpop.eup %581 }
 0x227   :  { %v221_v29 = vmul.f32 %v582_v28, %v215_v26  ;;  %v228_v33 = vsub.f32 %v224_v32, %v226_v31 }
 0x229   :  { %231 = vperm.xlu1 %578, %v221_v29   ;;  %v225_v34 = vmul.f32 %v221_v29, %v193_v3 }
 0x22b   :  { %v227_v36 = vsub.f32 %v223_v35, %v225_v34 }
 0x22d   :  { %236 = vperm.xlu1 %578, %v222_v30  }
 0x231   :  { %250 = vperm.xlu1 %578, %v228_v33  }
 0x235   :  { %245 = vperm.xlu1 %578, %v227_v36  }
 0x239   :  { %292 = vperm.xlu1 %578, %v284_v37  }
 0x2a4   :  { %v232_v38 = vpop.permute.xlu1 %231 }
 0x2a5   :  { %v239_v46 = vmul.f32 %v232_v38, %v173_v60  ;;  %v240_v47 = vmul.f32 %v232_v38, %v810_v53 }
 0x2a8   :  { %v237_v39 = vpop.permute.xlu1 %236 }
 0x2a9   :  { %v241_v40 = vmul.f32 %v237_v39, %v179_v56  ;;  %v242_v41 = vmul.f32 %v237_v39, %v181_v54 }
 0x2ac   :  { %v251_v42 = vpop.permute.xlu1 %250 }
 0x2ad   :  { %v255_v44 = vadd.f32 %v251_v42, %v241_v40  ;;  %v256_v45 = vadd.f32 %v251_v42, %v242_v41 }
 0x2af   :  { %v263_v48 = vmin.f32 %v255_v44, 0.0  ;;  %v264_v49 = vmin.f32 %v256_v45, 0.0  ;;  %vm259_vm2 = vcmp.gt.f32.partialorder %v255_v44, 0.0  ;;  %vm260_vm3 = vcmp.gt.f32.partialorder %v256_v45, 0.0 }
 0x2b0   :  { %v246_v50 = vpop.permute.xlu1 %245 }
 0x2b1   :  { %v269_v51 = vmul.f32 1.442695, %v263_v48  ;;  %v271_v52 = vmul.f32 1.442695, %v264_v49  ;;  %v253_v57 = vadd.f32 %v246_v50, %v239_v46  ;;  %v254_v58 = vadd.f32 %v246_v50, %v240_v47  ;;  %v410_v50 = vld [vmem:[%s904_s7] sm:$0xff] }
 0x2b3   :  { %583 = vpow2.f32 %v269_v51  ;;  %v261_v59 = vmin.f32 %v253_v57, 0.0  ;;  %v262_v61 = vmin.f32 %v254_v58, 0.0  ;;  %vm257_vm4 = vcmp.gt.f32.partialorder %v253_v57, 0.0 }
 0x2b4   :  { %585 = vpow2.f32 %v271_v52  ;;  %vm258_vm5 = vcmp.gt.f32.partialorder %v254_v58, 0.0  ;;  %v293_v21 = vpop.permute.xlu1 %292 }
 0x2b5   :  { %v265_v62 = vmul.f32 1.442695, %v261_v59  ;;  %v267_v56 = vmul.f32 1.442695, %v262_v61 }
 0x2b7   :  { %587 = vpow2.f32 %v265_v62 }
 0x2b8   :  { %589 = vpow2.f32 %v267_v56 }
 0x2c0   :  { %v584_v54 = vpop.eup %583 }
 0x2c1   :  { %v586_v63 = vpop.eup %585  ;;  %v567_v60 = vadd.f32 -1.0, %v584_v54  ;;  %v419_v54 = vld [vmem:[%s905_s8 + $0x8] sm:$0xff] }
 0x2c2   :  { %v568_v0 = vadd.f32 -1.0, %v586_v63 }
 0x2c3   :  { %v279_v53 = vsel %vm259_vm2, %v255_v44, %v567_v60 }
 0x2c4   :  { %v588_v1 = vpop.eup %587  ;;  %v280_v2 = vsel %vm260_vm3, %v256_v45, %v568_v0 }
 0x2c5   :  { %v590_v3 = vpop.eup %589  ;;  %329 = vmatprep.subr.mxu1 %v280_v2  ;;  %v565_v4 = vadd.f32 -1.0, %v588_v1 }
 0x2c6   :  { %330 = vmatpush1.msra.mxu1 %v279_v53  ;;  %v566_v5 = vadd.f32 -1.0, %v590_v3 }
 0x2c7   :  { %v277_v6 = vsel %vm257_vm4, %v253_v57, %v565_v4  ;;  %v418_v57 = vld [vmem:[%s905_s8] sm:$0xff] }
 0x2c8   :  { %v278_v7 = vsel %vm258_vm5, %v254_v58, %v566_v5  ;;  %v411_v58 = vld [vmem:[%s904_s7 + $0x8] sm:$0xff] }
 0x2c9   :  { %331 = vmatprep.subr.mxu1 %v278_v7 }
 0x2ca   :  { %332 = vmatpush1.msra.mxu1 %v277_v6 }
 0x2cb   :  { %569 = vmatmul.mubr.msk.f32.vlgmr.msra.gmra.mxu1 %vm99_vm0, %v281_v8 }
 0x2cc   :  { %371 = vmatprep.mubr.f32.mxu1 %v608_v43 }
 0x2cf   :  { %570 = vmatmul.mubr.msk.f32.gmra.mxu1 %vm99_vm0, %v282_v9 }
 0x38b   :  { %v367_v10 = vpop.f32.mrf.mxu1 }
 0x38c   :  { %v368_v19 = vadd.f32 %v367_v10, %v288_v11 }
 0x38d   :  { %v369_v12 = vpop.f32.mrf.mxu1 }
 0x38e   :  { %v370_v16 = vadd.f32 %v369_v12, %v288_v11 }
 0x38f   :  { %v373_v18 = vpop.f32.mrf.mxu1 }
 0x390   :  { %v379_v20 = vmul.f32 %v813_v55, %v370_v16  ;;  %v374_v25 = vadd.f32 %v373_v18, %v293_v21 }
 0x391   :  { %v375_v22 = vpop.f32.mrf.mxu1 }
 0x392   :  { %v376_v23 = vadd.f32 %v375_v22, %v293_v21  ;;  %v382_v24 = vadd.f32 %v379_v20, %v368_v19 }
 0x394   :  { %383 = vadd.xlane.f32.xlu1 %v382_v24  ;;  %v381_v43 = vmul.f32 %v813_v55, %v376_v23 }
 0x396   :  { %v385_v26 = vadd.f32 %v381_v43, %v374_v25 }
 0x398   :  { %386 = vadd.xlane.f32.xlu0 %v385_v26 }
 0x41d   :  { %v384_v27 = vpop.xlane.xlu1 %383 }
 0x41e   :  { %v388_v28 = vmul.f32 0.004464286, %v384_v27 }
 0x420   :  { %v391_v29 = vsub.f32 %v370_v16, %v388_v28  ;;  %v390_v30 = vsub.f32 %v368_v19, %v388_v28 }
 0x421   :  { %v387_v31 = vpop.xlane.xlu0 %386 }
 0x422   :  { %v389_v32 = vmul.f32 0.004464286, %v387_v31  ;;  %v395_v33 = vmul.f32 %v391_v29, %v391_v29  ;;  %v394_v35 = vmul.f32 %v390_v30, %v390_v30 }
 0x424   :  { %v393_v34 = vsub.f32 %v376_v23, %v389_v32  ;;  %v399_v36 = vmul.f32 %v813_v55, %v395_v33  ;;  %v392_v37 = vsub.f32 %v374_v25, %v389_v32 }
 0x426   :  { %v402_v38 = vadd.f32 %v399_v36, %v394_v35  ;;  %v397_v39 = vmul.f32 %v393_v34, %v393_v34  ;;  %v396_v40 = vmul.f32 %v392_v37, %v392_v37 }
 0x428   :  { %403 = vadd.xlane.f32.xlu1 %v402_v38  ;;  %v401_v41 = vmul.f32 %v813_v55, %v397_v39 }
 0x42a   :  { %v405_v42 = vadd.f32 %v401_v41, %v396_v40 }
 0x42c   :  { %406 = vadd.xlane.f32.xlu1 %v405_v42 }
 0x4b1   :  { %v404_v44 = vpop.xlane.xlu1 %403 }
 0x4b2   :  { %v408_v45 = vmul.f32 0.004464286, %v404_v44 }
 0x4b4   :  { %v412_v46 = vadd.f32 1e-05, %v408_v45 }
 0x4b5   :  { %v407_v47 = vpop.xlane.xlu1 %406 }
 0x4b6   :  { %591 = vrsqrt.f32 %v412_v46  ;;  %v409_v48 = vmul.f32 0.004464286, %v407_v47 }
 0x4b8   :  { %v413_v49 = vadd.f32 1e-05, %v409_v48 }
 0x4ba   :  { %593 = vrsqrt.f32 %v413_v49 }
 0x4c3   :  { %v592_v51 = vpop.eup %591 }
 0x4c4   :  { %v416_v52 = vmul.f32 %v592_v51, %v410_v50 }
 0x4c6   :  { %426 = vperm.xlu1 %578, %v416_v52   ;;  %v420_v59 = vmul.f32 %v416_v52, %v388_v28 }
 0x4c7   :  { %v594_v61 = vpop.eup %593 }
 0x4c8   :  { %v422_v62 = vsub.f32 %v418_v57, %v420_v59  ;;  %v417_v56 = vmul.f32 %v594_v61, %v411_v58 }
 0x4ca   :  { %440 = vperm.xlu1 %578, %v422_v62   ;;  %431 = vperm.xlu0 %577, %v417_v56   ;;  %v421_v63 = vmul.f32 %v417_v56, %v389_v32 }
 0x4cc   :  { %v423_v60 = vsub.f32 %v419_v54, %v421_v63 }
 0x4ce   :  { %445 = vperm.xlu1 %578, %v423_v60   ;;  %v512_v60 = vld [vmem:[%s906_s9] sm:$0xff] }
 0x541   :  { %v427_v0 = vpop.permute.xlu1 %426 }
 0x542   :  { %v434_v53 = vmul.f32 %v427_v0, %v368_v19  ;;  %v435_v1 = vmul.f32 %v427_v0, %v370_v16 }
 0x545   :  { %v432_v2 = vpop.permute.xlu0 %431  ;;  %v441_v3 = vpop.permute.xlu1 %440 }
 0x546   :  { %v448_v4 = vadd.f32 %v441_v3, %v434_v53  ;;  %v449_v5 = vadd.f32 %v441_v3, %v435_v1  ;;  %v436_v6 = vmul.f32 %v432_v2, %v374_v25  ;;  %v437_v7 = vmul.f32 %v432_v2, %v376_v23  ;;  %v513_v1 = vld [vmem:[%s906_s9 + $0x8] sm:$0xff] }
 0x548   :  { %v456_v8 = vmin.f32 %v448_v4, 0.0  ;;  %v457_v9 = vmin.f32 %v449_v5, 0.0  ;;  %vm452_vm6 = vcmp.gt.f32.partialorder %v448_v4, 0.0  ;;  %vm453_vm7 = vcmp.gt.f32.partialorder %v449_v5, 0.0 }
 0x549   :  { %v446_v10 = vpop.permute.xlu1 %445 }
 0x54a   :  { %v460_v11 = vmul.f32 1.442695, %v456_v8  ;;  %v462_v12 = vmul.f32 1.442695, %v457_v9  ;;  %v450_v18 = vadd.f32 %v446_v10, %v436_v6  ;;  %v451_v20 = vadd.f32 %v446_v10, %v437_v7  ;;  %v521_v6 = vld [vmem:[%s907_s10 + $0x8] sm:$0xff] }
 0x54c   :  { %595 = vpow2.f32 %v460_v11  ;;  %v458_v21 = vmin.f32 %v450_v18, 0.0  ;;  %v459_v22 = vmin.f32 %v451_v20, 0.0  ;;  %vm454_vm8 = vcmp.gt.f32.partialorder %v450_v18, 0.0 }
 0x54d   :  { %597 = vpow2.f32 %v462_v12  ;;  %vm455_vm9 = vcmp.gt.f32.partialorder %v451_v20, 0.0 }
 0x54e   :  { %v464_v24 = vmul.f32 1.442695, %v458_v21  ;;  %v466_v19 = vmul.f32 1.442695, %v459_v22 }
 0x550   :  { %599 = vpow2.f32 %v464_v24 }
 0x551   :  { %601 = vpow2.f32 %v466_v19 }
 0x559   :  { %v596_v16 = vpop.eup %595 }
 0x55a   :  { %v598_v43 = vpop.eup %597  ;;  %v571_v26 = vadd.f32 -1.0, %v596_v16 }
 0x55b   :  { %v572_v25 = vadd.f32 -1.0, %v598_v43 }
 0x55c   :  { %v472_v27 = vsel %vm452_vm6, %v448_v4, %v571_v26 }
 0x55d   :  { %v600_v23 = vpop.eup %599  ;;  %v473_v28 = vsel %vm453_vm7, %v449_v5, %v572_v25  ;;  %v476_v33 = vadd.f32 %v472_v27, %v727_v17 }
 0x55e   :  { %v602_v29 = vpop.eup %601  ;;  %v477_v30 = vadd.f32 %v473_v28, %v718_v15  ;;  %v573_v31 = vadd.f32 -1.0, %v600_v23 }
 0x55f   :  { %v574_v32 = vadd.f32 -1.0, %v602_v29 }
 0x560   :  { %v481_v34 = vmul.f32 %v813_v55, %v477_v30  ;;  %v474_v35 = vsel %vm454_vm8, %v450_v18, %v573_v31 }
 0x561   :  { %v475_v36 = vsel %vm455_vm9, %v451_v20, %v574_v32  ;;  %v478_v39 = vadd.f32 %v474_v35, %v713_v14 }
 0x562   :  { %v479_v37 = vadd.f32 %v475_v36, %v708_v13  ;;  %v484_v38 = vadd.f32 %v481_v34, %v476_v33 }
 0x564   :  { %485 = vadd.xlane.f32.xlu0 %v484_v38  ;;  %v483_v40 = vmul.f32 %v813_v55, %v479_v37 }
 0x566   :  { %v487_v41 = vadd.f32 %v483_v40, %v478_v39 }
 0x568   :  { %488 = vadd.xlane.f32.xlu1 %v487_v41 }
 0x5ed   :  { %v486_v15 = vpop.xlane.xlu0 %485 }
 0x5ee   :  { %v490_v42 = vmul.f32 0.004464286, %v486_v15 }
 0x5f0   :  { %v493_v44 = vsub.f32 %v477_v30, %v490_v42  ;;  %v492_v45 = vsub.f32 %v476_v33, %v490_v42 }
 0x5f1   :  { %v489_v46 = vpop.xlane.xlu1 %488 }
 0x5f2   :  { %v491_v17 = vmul.f32 0.004464286, %v489_v46  ;;  %v497_v47 = vmul.f32 %v493_v44, %v493_v44  ;;  %v496_v49 = vmul.f32 %v492_v45, %v492_v45 }
 0x5f4   :  { %v495_v48 = vsub.f32 %v479_v37, %v491_v17  ;;  %v501_v50 = vmul.f32 %v813_v55, %v497_v47  ;;  %v494_v13 = vsub.f32 %v478_v39, %v491_v17 }
 0x5f6   :  { %v504_v51 = vadd.f32 %v501_v50, %v496_v49  ;;  %v499_v52 = vmul.f32 %v495_v48, %v495_v48  ;;  %v498_v14 = vmul.f32 %v494_v13, %v494_v13 }
 0x5f8   :  { %505 = vadd.xlane.f32.xlu0 %v504_v51  ;;  %v503_v57 = vmul.f32 %v813_v55, %v499_v52  ;;  %v520_v55 = vld [vmem:[%s907_s10] sm:$0xff] }
 0x5fa   :  { %v507_v58 = vadd.f32 %v503_v57, %v498_v14 }
 0x5fc   :  { %508 = vadd.xlane.f32.xlu0 %v507_v58 }
 0x681   :  { %v506_v59 = vpop.xlane.xlu0 %505 }
 0x682   :  { %v510_v61 = vmul.f32 0.004464286, %v506_v59 }
 0x684   :  { %v514_v62 = vadd.f32 1e-05, %v510_v61 }
 0x685   :  { %v509_v56 = vpop.xlane.xlu0 %508 }
 0x686   :  { %603 = vrsqrt.f32 %v514_v62  ;;  %v511_v54 = vmul.f32 0.004464286, %v509_v56 }
 0x688   :  { %v515_v63 = vadd.f32 1e-05, %v511_v54 }
 0x68a   :  { %605 = vrsqrt.f32 %v515_v63 }
 0x693   :  { %v604_v0 = vpop.eup %603 }
 0x694   :  { %v518_v53 = vmul.f32 %v604_v0, %v512_v60 }
 0x696   :  { %528 = vperm.xlu1 %578, %v518_v53   ;;  %v522_v2 = vmul.f32 %v518_v53, %v490_v42 }
 0x697   :  { %v606_v3 = vpop.eup %605 }
 0x698   :  { %v524_v4 = vsub.f32 %v520_v55, %v522_v2  ;;  %v519_v5 = vmul.f32 %v606_v3, %v513_v1 }
 0x69a   :  { %542 = vperm.xlu1 %578, %v524_v4   ;;  %533 = vperm.xlu0 %577, %v519_v5   ;;  %v523_v7 = vmul.f32 %v519_v5, %v491_v17 }
 0x69c   :  { %v525_v8 = vsub.f32 %v521_v6, %v523_v7 }
 0x69e   :  { %547 = vperm.xlu1 %578, %v525_v8  }
 0x711   :  { %v529_v9 = vpop.permute.xlu1 %528 }
 0x712   :  { %v536_v10 = vmul.f32 %v529_v9, %v476_v33  ;;  %v537_v11 = vmul.f32 %v529_v9, %v477_v30 }
 0x715   :  { %v534_v12 = vpop.permute.xlu0 %533  ;;  %v543_v18 = vpop.permute.xlu1 %542 }
 0x716   :  { %v550_v20 = vadd.f32 %v543_v18, %v536_v10  ;;  %v551_v21 = vadd.f32 %v543_v18, %v537_v11  ;;  %v538_v22 = vmul.f32 %v534_v12, %v478_v39  ;;  %v539_v24 = vmul.f32 %v534_v12, %v479_v37 }
 0x718   :  { %554 = vst [vmem:[%s908_s11] sm:$0xff] %v550_v20  ;;  %555 = vst [vmem:[%s908_s11 + $0x8] sm:$0xff] %v551_v21 }
 0x719   :  { %v548_v19 = vpop.permute.xlu1 %547 }
 0x71a   :  { %v552_v16 = vadd.f32 %v548_v19, %v538_v22  ;;  %v553_v43 = vadd.f32 %v548_v19, %v539_v24 }
 0x71c   :  { %556 = vst [vmem:[%s908_s11 + $0x10] sm:$0xff] %v552_v16  ;;  %557 = vst [vmem:[%s908_s11 + $0x18] sm:$0xff] %v553_v43 }

</bundles_post_ra>
